<compile_context>
chip_gen: v5e
topology: v5e:2x2
jax: 0.10.0
libtpu: 0.0.40
codegen_flags: <defaults>
</compile_context>

<pallas_src>
import jax
import jax.numpy as jnp
from jax.experimental import pallas as pl
from jax.experimental.pallas import tpu as pltpu


def _round_up(a: int, b: int) -> int:
    return (a + b - 1) // b * b


# --------------- Path A: whole weight resident in VMEM ----------------------

def _conv1d_kernel_resident(x_ref, w_ref, b_ref, o_ref):
    # Weight / bias block indices are constant across the grid, so Pallas keeps
    # them resident (single DMA); x and out stream once over M tiles.
    acc = jnp.dot(x_ref[...], w_ref[...], preferred_element_type=jnp.float32)
    o_ref[...] = (acc + b_ref[...].astype(jnp.float32)).astype(o_ref.dtype)


# --------------- Path B: tiled (i, j, k) K-reduction -------------------------

def _conv1d_kernel_f32_out(x_ref, w_ref, b_ref, o_ref):
    # Output block index (i, j) is constant across k -> o_ref stays resident;
    # accumulate straight into it (saves the tm x tn x 4B scratch + final copy).
    k = pl.program_id(2)

    @pl.when(k == 0)
    def _():
        o_ref[...] = jnp.broadcast_to(
            b_ref[...].astype(jnp.float32), o_ref.shape)

    o_ref[...] += jnp.dot(
        x_ref[...], w_ref[...], preferred_element_type=jnp.float32)


def _conv1d_kernel_acc(x_ref, w_ref, b_ref, o_ref, acc_ref):
    # Non-f32 output: keep an f32 VMEM accumulator, cast on the last k step.
    k = pl.program_id(2)

    @pl.when(k == 0)
    def _():
        acc_ref[...] = jnp.broadcast_to(
            b_ref[...].astype(jnp.float32), acc_ref.shape)

    acc_ref[...] += jnp.dot(
        x_ref[...], w_ref[...], preferred_element_type=jnp.float32)

    @pl.when(k == pl.num_programs(2) - 1)
    def _():
        o_ref[...] = acc_ref[...].astype(o_ref.dtype)


def _vmem_limit(needed_bytes: int) -> int:
    # At least the default scoped limit (32 MiB), at most comfortably under the
    # v7x 64 MiB physical VMEM; v5e/v6e have 128 MiB so this is always safe.
    return int(min(max(int(needed_bytes * 1.5), 32 * 1024 * 1024),
                   56 * 1024 * 1024))


def conv1d_pallas(x, weight, bias, *, tm=256, tn=256, tk=512,
                  weight_resident_bytes=12 * 1024 * 1024):
    """y = x @ weight + bias over the last axis of x.

    x: (..., nx), weight: (nx, nf), bias: (nf,)  ->  (..., nf)
    """
    nx, nf = weight.shape
    orig_shape = x.shape
    assert orig_shape[-1] == nx
    out_dtype = x.dtype

    x2d = x.reshape(-1, nx)
    M = x2d.shape[0]

    # MXU / vreg friendly effective tiles, clamped only when the problem is
    # genuinely smaller than a tile (sublane multiple of 8, lane multiple of 128).
    tm_eff = min(tm, _round_up(M, 8))
    tn_eff = min(tn, _round_up(nf, 128))
    tk_eff = min(tk, _round_up(nx, 128))

    M_pad = _round_up(M, tm_eff)
    nf_pad = _round_up(nf, tn_eff)
    nx_pad = _round_up(nx, tk_eff)

    # Zero-pad to the tile grid (zeros contribute nothing to the matmul; extra
    # rows/cols are sliced off afterwards).
    if (M_pad, nx_pad) != (M, nx):
        x2d = jnp.pad(x2d, ((0, M_pad - M), (0, nx_pad - nx)))
    w_p = weight
    if (nx_pad, nf_pad) != (nx, nf):
        w_p = jnp.pad(weight, ((0, nx_pad - nx), (0, nf_pad - nf)))
    b_p = bias if nf_pad == nf else jnp.pad(bias, (0, nf_pad - nf))
    b2d = b_p.reshape(1, nf_pad)

    x_bytes = jnp.dtype(x2d.dtype).itemsize
    w_bytes_per = jnp.dtype(w_p.dtype).itemsize
    o_bytes = jnp.dtype(out_dtype).itemsize
    w_total_bytes = nx_pad * nf_pad * w_bytes_per

    if w_total_bytes <= weight_resident_bytes:
        # ------------------- Path A: weight-resident -------------------------
        grid = (M_pad // tm_eff,)
        needed = (2 * tm_eff * nx_pad * x_bytes      # double-buffered x tiles
                  + 2 * w_total_bytes                # weight (conservative 2x)
                  + 2 * nf_pad * 4                   # bias
                  + 2 * tm_eff * nf_pad * o_bytes)   # output tiles
        out = pl.pallas_call(
            _conv1d_kernel_resident,
            out_shape=jax.ShapeDtypeStruct((M_pad, nf_pad), out_dtype),
            grid_spec=pltpu.PrefetchScalarGridSpec(
                num_scalar_prefetch=0,
                grid=grid,
                in_specs=[
                    pl.BlockSpec((tm_eff, nx_pad), lambda i: (i, 0)),   # x
                    pl.BlockSpec((nx_pad, nf_pad), lambda i: (0, 0)),   # weight
                    pl.BlockSpec((1, nf_pad), lambda i: (0, 0)),        # bias
                ],
                out_specs=pl.BlockSpec((tm_eff, nf_pad), lambda i: (i, 0)),
            ),
            compiler_params=pltpu.CompilerParams(
                dimension_semantics=("parallel",),
                vmem_limit_bytes=_vmem_limit(needed),
            ),
        )(x2d, w_p, b2d)
    else:
        # ------------------- Path B: tiled K-reduction -----------------------
        grid = (M_pad // tm_eff, nf_pad // tn_eff, nx_pad // tk_eff)
        f32_out = out_dtype == jnp.float32
        kernel = _conv1d_kernel_f32_out if f32_out else _conv1d_kernel_acc
        scratch = [] if f32_out else [pltpu.VMEM((tm_eff, tn_eff), jnp.float32)]
        needed = (2 * tm_eff * tk_eff * x_bytes
                  + 2 * tk_eff * tn_eff * w_bytes_per
                  + 2 * tn_eff * 4
                  + 2 * tm_eff * tn_eff * o_bytes
                  + (0 if f32_out else tm_eff * tn_eff * 4))
        out = pl.pallas_call(
            kernel,
            out_shape=jax.ShapeDtypeStruct((M_pad, nf_pad), out_dtype),
            grid_spec=pltpu.PrefetchScalarGridSpec(
                num_scalar_prefetch=0,
                grid=grid,
                in_specs=[
                    pl.BlockSpec((tm_eff, tk_eff), lambda i, j, k: (i, k)),  # x
                    pl.BlockSpec((tk_eff, tn_eff), lambda i, j, k: (k, j)),  # w
                    pl.BlockSpec((1, tn_eff), lambda i, j, k: (0, j)),       # b
                ],
                out_specs=pl.BlockSpec((tm_eff, tn_eff), lambda i, j, k: (i, j)),
                scratch_shapes=scratch,
            ),
            compiler_params=pltpu.CompilerParams(
                dimension_semantics=("parallel", "parallel", "arbitrary"),
                vmem_limit_bytes=_vmem_limit(needed),
            ),
        )(x2d, w_p, b2d)

    if (M_pad, nf_pad) != (M, nf):
        out = out[:M, :nf]
    return out.reshape(orig_shape[:-1] + (nf,))


def init_conv1d_params(key, nx, nf, dtype=jnp.float32):
    # matches nn.init.normal_(w, std=0.02) and zero bias
    w = 0.02 * jax.random.normal(key, (nx, nf), dtype=dtype)
    b = jnp.zeros((nf,), dtype=dtype)
    return w, b


if __name__ == "__main__":
    # small shapes consistent with the forward: (batch, seq, nx) -> (batch, seq, nf)
    batch, seq, nx, nf = 2, 8, 128, 256

    key = jax.random.PRNGKey(0)
    kx, kw = jax.random.split(key)

    x = jax.random.normal(kx, (batch, seq, nx), dtype=jnp.float32)
    weight, bias = init_conv1d_params(kw, nx, nf)
    # give the bias non-trivial values so the fused add is actually checked
    bias = bias + 0.1 * jnp.arange(nf, dtype=jnp.float32) / nf

    # Path A: weight-resident fast path
    y = jax.block_until_ready(conv1d_pallas(x, weight, bias))
    y_ref = (x.reshape(-1, nx) @ weight + bias).reshape(batch, seq, nf)
    assert y.shape == (batch, seq, nf)
    assert jnp.allclose(y, y_ref, atol=1e-5, rtol=1e-5)

    # Path B: tiled K-reduction (forced), with a non-tile-aligned M to exercise
    # the padding path (M = 2*5 = 10, not a multiple of 8).
    x_odd = x[:, :5, :]
    y_b = jax.block_until_ready(
        conv1d_pallas(x_odd, weight, bias, weight_resident_bytes=0))
    y_b_ref = (x_odd.reshape(-1, nx) @ weight + bias).reshape(batch, 5, nf)
    assert y_b.shape == (batch, 5, nf)
    assert jnp.allclose(y_b, y_b_ref, atol=1e-5, rtol=1e-5)

    print("KERNEL_OK")
</pallas_src>

<mosaic_0001>
module attributes {stable_mosaic.version = 11 : i64} {
  func.func @_conv1d_kernel_resident(%arg0: i32, %arg1: memref<16x128xf32, #tpu.memory_space<vmem>>, %arg2: memref<128x256xf32, #tpu.memory_space<vmem>>, %arg3: memref<1x256xf32, #tpu.memory_space<vmem>>, %arg4: memref<16x256xf32, #tpu.memory_space<vmem>>) attributes {dimension_semantics = [#tpu.dimension_semantics<parallel>], iteration_bounds = array<i64: 1>, scalar_prefetch = 0 : i64, scratch_operands = 0 : i64, tpu.core_type = #tpu.core_type<tc>, window_params = [{transform_indices = @transform_0, window_bounds = array<i64: 16, 128>}, {pipeline_mode = #tpu.pipeline_mode<synchronous>, transform_indices = @transform_1, window_bounds = array<i64: 128, 256>}, {pipeline_mode = #tpu.pipeline_mode<synchronous>, transform_indices = @transform_2, window_bounds = array<i64: 1, 256>}, {transform_indices = @transform_3, window_bounds = array<i64: 16, 256>}]} {
    %c0 = arith.constant 0 : index
    %c0_0 = arith.constant 0 : index
    %0 = vector.load %arg1[%c0, %c0_0] : memref<16x128xf32, #tpu.memory_space<vmem>>, vector<16x128xf32>
    %c0_1 = arith.constant 0 : index
    %c0_2 = arith.constant 0 : index
    %1 = vector.load %arg2[%c0_1, %c0_2] : memref<128x256xf32, #tpu.memory_space<vmem>>, vector<128x256xf32>
    %cst = arith.constant dense<0.000000e+00> : vector<16x256xf32>
    %2 = tpu.matmul %0, %1, %cst {dimension_numbers = #tpu.dot_dimension_numbers<[1], [0], [0], [1], [0, 0, 1, 1], [], []>} : vector<16x128xf32>, vector<128x256xf32>, vector<16x256xf32> -> vector<16x256xf32>
    %c0_3 = arith.constant 0 : index
    %c0_4 = arith.constant 0 : index
    %3 = vector.load %arg3[%c0_3, %c0_4] : memref<1x256xf32, #tpu.memory_space<vmem>>, vector<1x256xf32>
    %4 = vector.broadcast %3 : vector<1x256xf32> to vector<16x256xf32>
    %5 = arith.addf %2, %4 : vector<16x256xf32>
    %c0_5 = arith.constant 0 : index
    %c0_6 = arith.constant 0 : index
    %6 = vector.load %arg4[%c0_5, %c0_6] : memref<16x256xf32, #tpu.memory_space<vmem>>, vector<16x256xf32>
    tpu.vector_store %arg4[%c0_5, %c0_6], %5 {strides = array<i32>} : memref<16x256xf32, #tpu.memory_space<vmem>>, vector<16x256xf32>,
    return
  }
  func.func @transform_0(%arg0: i32) -> (i32, i32) {
    %c0_i32 = arith.constant 0 : i32
    %c0_i32_0 = arith.constant 0 : i32
    return %arg0, %c0_i32 : i32, i32
  }
  func.func @transform_1(%arg0: i32) -> (i32, i32) {
    %c0_i32 = arith.constant 0 : i32
    %c0_i32_0 = arith.constant 0 : i32
    %c0_i32_1 = arith.constant 0 : i32
    return %c0_i32, %c0_i32_0 : i32, i32
  }
  func.func @transform_2(%arg0: i32) -> (i32, i32) {
    %c0_i32 = arith.constant 0 : i32
    %c0_i32_0 = arith.constant 0 : i32
    %c0_i32_1 = arith.constant 0 : i32
    return %c0_i32, %c0_i32_0 : i32, i32
  }
  func.func @transform_3(%arg0: i32) -> (i32, i32) {
    %c0_i32 = arith.constant 0 : i32
    %c0_i32_0 = arith.constant 0 : i32
    return %arg0, %c0_i32 : i32, i32
  }
}

</mosaic_0001>

<bundles_post_ra>
// kernel: tpu_custom_call.1
= control target key start
LH: loop header
LB: loop body
LE: loop exit
PB: predicated region body
PF: predicated region fallthrough
CT: control target
= control target key end

     0   :  { %8 = vsyncpa [#allocation3], 0  ;;  %s358_s0 = inlined_call_operand.hbm [shape: f32[16,128], index: 0, kind: input, shape index: {}]   ;;  %s359_s1 = inlined_call_operand.hbm [shape: f32[128,256], index: 1, kind: input, shape index: {}]   ;;  %s360_s2 = inlined_call_operand.hbm [shape: f32[1,256], index: 2, kind: input, shape index: {}]   ;;  %s361_s3 = inlined_call_operand.hbm [shape: f32[16,256], index: 3, kind: output, shape index: {}]  }
   0x1   :  { %9 = vsyncpa [#allocation6], 0  ;;  %s28_s14 = sshll.u32 %s359_s1, 4  ;;  %s29_s14 = int_to_ptr.hbm [resolvable:$true] %s28_s14 }
   0x2   :  { %10 = vsyncpa [#allocation4], 0  ;;  %s312_s15 = smov [#allocation5]   ;;  %s15_s19 = sshll.u32 %s358_s0, 4  ;;  %s16_s19 = int_to_ptr.hbm [resolvable:$true] %s15_s19 }
   0x3   :  { %s30_s16 = sshll.u32 %s312_s15, 4  ;;  %s313_s20 = smov 256   ;;  %s31_s16 = int_to_ptr.vmem [resolvable:$true] %s30_s16 }
   0x4   :  { %s314_s21 = smov 16   ;;  %s315_s22 = smov [#allocation2]  }
   0x5   :  { %36 = dma.hbm_to_vmem [thread:$0]  %s29_s14, 4096, %s31_s16, [#allocation6], %s313_s20, %s313_s20, %s314_s21  }
   0x6   :  { %s17_s23 = sshll.u32 %s315_s22, 4  ;;  %s316_s1 = smov 128   ;;  %s18_s23 = int_to_ptr.vmem [resolvable:$true] %s17_s23 }
   0x7   :  { %s317_s24 = smov 8   ;;  %s42_s27 = sshll.u32 %s360_s2, 4  ;;  %s43_s27 = int_to_ptr.hbm [resolvable:$true] %s42_s27 }
   0x8   :  { %23 = dma.hbm_to_vmem [thread:$0]  %s16_s19, 256, %s18_s23, [#allocation3], %s316_s1, %s316_s1, %s317_s24  }
   0x9   :  { %s318_s28 = smov [#allocation7]  }
   0xa   :  { %s44_s0 = sshll.u32 %s318_s28, 4  ;;  %s45_s0 = int_to_ptr.vmem [resolvable:$true] %s44_s0 }
   0xb   :  { %47 = dma.hbm_to_vmem [thread:$0]  %s43_s27, 32, %s45_s0, [#allocation6]  }
   0xc   :  { %306 = dma.done.wait [#allocation3], 256  }
   0xd   :  { %307 = vsyncadd [#allocation3], 4294967040 }
   0xe   :  { %308 = dma.done.wait [#allocation6], 4128  }
   0xf   :  { %309 = vsyncadd [#allocation6], 4294963168  ;;  %v92_v0 = vld [vmem:[#allocation5 + $0xf0] sm:$0xff]  ;;  %v93_v1 = vld [vmem:[#allocation5 + $0xf8] sm:$0xff]  ;;  %s319_s2 = smov [#allocation8]   ;;  %s156_s5 = sshll.u32 %s361_s3, 4  ;;  %s157_s5 = int_to_ptr.hbm [resolvable:$true] %s156_s5 }
  0x10   :  { %v90_v2 = vld [vmem:[#allocation5 + $0xe0] sm:$0xff]  ;;  %170 = vmatpush.msra.mxu2 %v92_v0  ;;  %186 = vmatpush.msra.mxu3 %v93_v1  ;;  %v91_v3 = vld [vmem:[#allocation5 + $0xe8] sm:$0xff]  ;;  %v88_v4 = vld [vmem:[#allocation5 + $0xd0] sm:$0xff]  ;;  %s154_s29 = sshll.u32 %s319_s2, 4  ;;  %s155_s29 = int_to_ptr.vmem [resolvable:$true] %s154_s29 }
  0x11   :  { %v89_v5 = vld [vmem:[#allocation5 + $0xd8] sm:$0xff]  ;;  %100 = vmatpush.msra.mxu0 %v92_v0  ;;  %123 = vmatpush.msra.mxu1 %v93_v1  ;;  %v86_v6 = vld [vmem:[#allocation5 + $0xc0] sm:$0xff]  ;;  %v87_v7 = vld [vmem:[#allocation5 + $0xc8] sm:$0xff] }
  0x12   :  { %171 = vmatpush.msra.mxu2 %v90_v2  ;;  %187 = vmatpush.msra.mxu3 %v91_v3  ;;  %v84_v8 = vld [vmem:[#allocation5 + $0xb0] sm:$0xff]  ;;  %v85_v9 = vld [vmem:[#allocation5 + $0xb8] sm:$0xff]  ;;  %v82_v10 = vld [vmem:[#allocation5 + $0xa0] sm:$0xff] }
  0x13   :  { %101 = vmatpush.msra.mxu0 %v90_v2  ;;  %124 = vmatpush.msra.mxu1 %v91_v3  ;;  %v83_v11 = vld [vmem:[#allocation5 + $0xa8] sm:$0xff]  ;;  %v80_v12 = vld [vmem:[#allocation5 + $0x90] sm:$0xff]  ;;  %v81_v13 = vld [vmem:[#allocation5 + $0x98] sm:$0xff] }
  0x14   :  { %172 = vmatpush.msra.mxu2 %v88_v4  ;;  %188 = vmatpush.msra.mxu3 %v89_v5  ;;  %v78_v14 = vld [vmem:[#allocation5 + $0x80] sm:$0xff]  ;;  %v79_v15 = vld [vmem:[#allocation5 + $0x88] sm:$0xff]  ;;  %v76_v16 = vld [vmem:[#allocation5 + $0x70] sm:$0xff] }
  0x15   :  { %102 = vmatpush.msra.mxu0 %v88_v4  ;;  %125 = vmatpush.msra.mxu1 %v89_v5  ;;  %v77_v17 = vld [vmem:[#allocation5 + $0x78] sm:$0xff]  ;;  %v74_v18 = vld [vmem:[#allocation5 + $0x60] sm:$0xff]  ;;  %v75_v19 = vld [vmem:[#allocation5 + $0x68] sm:$0xff] }
  0x16   :  { %173 = vmatpush.msra.mxu2 %v86_v6  ;;  %189 = vmatpush.msra.mxu3 %v87_v7  ;;  %v72_v20 = vld [vmem:[#allocation5 + $0x50] sm:$0xff]  ;;  %v73_v21 = vld [vmem:[#allocation5 + $0x58] sm:$0xff]  ;;  %v70_v22 = vld [vmem:[#allocation5 + $0x40] sm:$0xff] }
  0x17   :  { %103 = vmatpush.msra.mxu0 %v86_v6  ;;  %126 = vmatpush.msra.mxu1 %v87_v7  ;;  %v71_v23 = vld [vmem:[#allocation5 + $0x48] sm:$0xff]  ;;  %v68_v24 = vld [vmem:[#allocation5 + $0x30] sm:$0xff]  ;;  %v69_v25 = vld [vmem:[#allocation5 + $0x38] sm:$0xff] }
  0x18   :  { %174 = vmatpush.msra.mxu2 %v84_v8  ;;  %190 = vmatpush.msra.mxu3 %v85_v9  ;;  %v66_v26 = vld [vmem:[#allocation5 + $0x20] sm:$0xff]  ;;  %v67_v27 = vld [vmem:[#allocation5 + $0x28] sm:$0xff]  ;;  %v64_v28 = vld [vmem:[#allocation5 + $0x10] sm:$0xff] }
  0x19   :  { %104 = vmatpush.msra.mxu0 %v84_v8  ;;  %127 = vmatpush.msra.mxu1 %v85_v9  ;;  %v65_v29 = vld [vmem:[#allocation5 + $0x18] sm:$0xff]  ;;  %v62_v30 = vld [vmem:[#allocation5] sm:$0xff]  ;;  %v63_v31 = vld [vmem:[#allocation5 + $0x8] sm:$0xff] }
  0x1a   :  { %175 = vmatpush.msra.mxu2 %v82_v10  ;;  %191 = vmatpush.msra.mxu3 %v83_v11  ;;  %v61_v32 = vld [vmem:[#allocation2 + $0x8] sm:$0xff]  ;;  %v60_v33 = vld [vmem:[#allocation2] sm:$0xff]  ;;  %v94_v34 = vld [vmem:[#allocation7] sm:$0x3] }
  0x1b   :  { %105 = vmatpush.msra.mxu0 %v82_v10  ;;  %128 = vmatpush.msra.mxu1 %v83_v11  ;;  %v96_v35 = vperm.slane %v94_v34, 0  ;;  %v97_v36 = vperm.slane %v94_v34, 1 }
  0x1c   :  { %176 = vmatpush.msra.mxu2 %v80_v12  ;;  %192 = vmatpush.msra.mxu3 %v81_v13 }
  0x1d   :  { %106 = vmatpush.msra.mxu0 %v80_v12  ;;  %129 = vmatpush.msra.mxu1 %v81_v13 }
  0x1e   :  { %177 = vmatpush.msra.mxu2 %v78_v14  ;;  %193 = vmatpush.msra.mxu3 %v79_v15 }
  0x1f   :  { %107 = vmatpush.msra.mxu0 %v78_v14  ;;  %130 = vmatpush.msra.mxu1 %v79_v15 }
  0x20   :  { %178 = vmatpush.msra.mxu2 %v76_v16  ;;  %194 = vmatpush.msra.mxu3 %v77_v17 }
  0x21   :  { %108 = vmatpush.msra.mxu0 %v76_v16  ;;  %131 = vmatpush.msra.mxu1 %v77_v17 }
  0x22   :  { %179 = vmatpush.msra.mxu2 %v74_v18  ;;  %195 = vmatpush.msra.mxu3 %v75_v19 }
  0x23   :  { %109 = vmatpush.msra.mxu0 %v74_v18  ;;  %132 = vmatpush.msra.mxu1 %v75_v19 }
  0x24   :  { %180 = vmatpush.msra.mxu2 %v72_v20  ;;  %196 = vmatpush.msra.mxu3 %v73_v21 }
  0x25   :  { %110 = vmatpush.msra.mxu0 %v72_v20  ;;  %133 = vmatpush.msra.mxu1 %v73_v21 }
  0x26   :  { %181 = vmatpush.msra.mxu2 %v70_v22  ;;  %197 = vmatpush.msra.mxu3 %v71_v23 }
  0x27   :  { %111 = vmatpush.msra.mxu0 %v70_v22  ;;  %134 = vmatpush.msra.mxu1 %v71_v23 }
  0x28   :  { %182 = vmatpush.msra.mxu2 %v68_v24  ;;  %198 = vmatpush.msra.mxu3 %v69_v25 }
  0x29   :  { %112 = vmatpush.msra.mxu0 %v68_v24  ;;  %135 = vmatpush.msra.mxu1 %v69_v25 }
  0x2a   :  { %183 = vmatpush.msra.mxu2 %v66_v26  ;;  %199 = vmatpush.msra.mxu3 %v67_v27 }
  0x2b   :  { %113 = vmatpush.msra.mxu0 %v66_v26  ;;  %136 = vmatpush.msra.mxu1 %v67_v27 }
  0x2c   :  { %184 = vmatpush.msra.mxu2 %v64_v28  ;;  %200 = vmatpush.msra.mxu3 %v65_v29 }
  0x2d   :  { %114 = vmatpush.msra.mxu0 %v64_v28  ;;  %137 = vmatpush.msra.mxu1 %v65_v29 }
  0x2e   :  { %185 = vmatpush.msra.mxu2 %v62_v30  ;;  %201 = vmatpush.msra.mxu3 %v63_v31 }
  0x2f   :  { %119 = vmatmul.f32.vlgmr.msra.gmra.mxu2 %v61_v32  ;;  %142 = vmatmul.f32.vlgmr.msra.gmra.mxu3 %v61_v32 }
  0x30   :  { %115 = vmatpush.msra.mxu0 %v62_v30  ;;  %138 = vmatpush.msra.mxu1 %v63_v31 }
  0x31   :  { %116 = vmatmul.f32.vlgmr.msra.gmra.mxu0 %v60_v33  ;;  %139 = vmatmul.f32.vlgmr.msra.gmra.mxu1 %v60_v33 }
  0xae   :  { %v117_v37 = vpop.f32.mrf.mxu0  ;;  %v140_v38 = vpop.f32.mrf.mxu1 }
  0xaf   :  { %v118_v39 = vadd.f32 %v117_v37, %v96_v35  ;;  %v141_v40 = vadd.f32 %v140_v38, %v97_v36 }
  0xb1   :  { %146 = vst [vmem:[#allocation8] sm:$0xff] %v118_v39 }
  0xb2   :  { %v120_v41 = vpop.f32.mrf.mxu2  ;;  %147 = vst [vmem:[#allocation8 + $0x8] sm:$0xff] %v141_v40  ;;  %v143_v42 = vpop.f32.mrf.mxu3 }
  0xb3   :  { %v121_v43 = vadd.f32 %v120_v41, %v96_v35  ;;  %v144_v44 = vadd.f32 %v143_v42, %v97_v36 }
  0xb5   :  { %148 = vst [vmem:[#allocation8 + $0x10] sm:$0xff] %v121_v43 }
  0xb6   :  { %149 = vst [vmem:[#allocation8 + $0x18] sm:$0xff] %v144_v44 }
  0xb7   :  { %162 = dma.vmem_to_hbm [thread:$0]  %s155_s29, 512, %s157_s5, [#allocation4], %s313_s20, %s313_s20, %s314_s21  }
  0xb8   :  { %310 = dma.done.wait [#allocation4], 512  }
  0xb9   :  { %311 = vsyncadd [#allocation4], 4294966784 }
  0xba   :  { %167 = vsyncpa [#allocation3], 1 }
  0xbb   :  { %168 = vsyncpa [#allocation6], 1 }
  0xbc   :  { %169 = vsyncpa [#allocation4], 1 }

</bundles_post_ra>
